<compile_context>
chip_gen: v7x
topology: tpu7x:2x2x1
jax: 0.10.0
libtpu: 0.0.40
codegen_flags: <defaults>
</compile_context>

<pallas_src>
import numpy as np
import jax
import jax.numpy as jnp
from jax.experimental import pallas as pl
from jax.experimental.pallas import tpu as pltpu


# ----------------------------------------------------------------------------- kernel

def _scale_mask_kernel(x_ref, m_ref, o_ref):
    # Single fused elementwise pass in the input dtype: one vmul per element,
    # with the (per-channel or full) multiplier broadcast against the x block.
    o_ref[...] = x_ref[...] * m_ref[...]


# ----------------------------------------------------------------------------- tiling helpers

_TARGET_BLOCK_BYTES = 2 * 1024 * 1024  # ~2 MiB/block => <= ~10 MiB VMEM with double buffering


def _round_up(x, m):
    return ((x + m - 1) // m) * m


def _pick_tile(full, bytes_per_unit):
    """Tile length along one axis: full extent if it fits the budget, else a multiple of 8."""
    budget = max(1, _TARGET_BLOCK_BYTES // max(1, bytes_per_unit))
    if full <= budget:
        return full
    return max(8, (budget // 8) * 8)


# ----------------------------------------------------------------------------- pallas_call wrappers

def _dropout_channels_first(xf, m, tie):
    """xf: (B, C, L); m: (B, C) if tie else (B, C, L). Returns (B, C, L)."""
    B, C, L = xf.shape
    itemsize = jnp.dtype(xf.dtype).itemsize

    # Pad L to a multiple of 128 so blocks are lane-dense (unmasked vst), then view
    # the length axis as (rows, 128) so sublanes stay dense even for small C.
    Lp = _round_up(L, 128)
    if Lp != L:
        xf = jnp.pad(xf, ((0, 0), (0, 0), (0, Lp - L)))
        if not tie:
            m = jnp.pad(m, ((0, 0), (0, 0), (0, Lp - L)))
    R = Lp // 128
    xr = xf.reshape(B, C, R, 128)

    TR = _pick_tile(R, C * 128 * itemsize)
    grid = (B, pl.cdiv(R, TR))

    x_spec = pl.BlockSpec((1, C, TR, 128), lambda b, r: (b, 0, r, 0))
    o_spec = pl.BlockSpec((1, C, TR, 128), lambda b, r: (b, 0, r, 0))
    if tie:
        m_arr = m.reshape(B, C, 1, 1)
        m_spec = pl.BlockSpec((1, C, 1, 1), lambda b, r: (b, 0, 0, 0))
    else:
        m_arr = m.reshape(B, C, R, 128)
        m_spec = pl.BlockSpec((1, C, TR, 128), lambda b, r: (b, 0, r, 0))

    cost = pl.CostEstimate(
        flops=B * C * Lp,
        transcendentals=0,
        bytes_accessed=2 * B * C * Lp * itemsize + int(m_arr.size) * itemsize,
    )

    out = pl.pallas_call(
        _scale_mask_kernel,
        out_shape=jax.ShapeDtypeStruct((B, C, R, 128), xf.dtype),
        grid=grid,
        in_specs=[x_spec, m_spec],
        out_specs=o_spec,
        compiler_params=pltpu.CompilerParams(
            dimension_semantics=("parallel", "parallel")),
        cost_estimate=cost,
    )(xr, m_arr)

    out = out.reshape(B, C, Lp)
    if Lp != L:
        out = out[:, :, :L]
    return out


def _dropout_channels_last(xf, m, tie):
    """xf: (B, L, C); m: (B, C) if tie else (B, L, C). Returns (B, L, C)."""
    B, L, C = xf.shape
    itemsize = jnp.dtype(xf.dtype).itemsize

    # Budget accounts for lane padding in VMEM when C < 128.
    TL = _pick_tile(L, _round_up(C, 128) * itemsize)
    grid = (B, pl.cdiv(L, TL))

    x_spec = pl.BlockSpec((1, TL, C), lambda b, l: (b, l, 0))
    o_spec = pl.BlockSpec((1, TL, C), lambda b, l: (b, l, 0))
    if tie:
        m_arr = m.reshape(B, 1, C)
        m_spec = pl.BlockSpec((1, 1, C), lambda b, l: (b, 0, 0))
    else:
        m_arr = m
        m_spec = pl.BlockSpec((1, TL, C), lambda b, l: (b, l, 0))

    cost = pl.CostEstimate(
        flops=B * L * C,
        transcendentals=0,
        bytes_accessed=2 * B * L * C * itemsize + int(m_arr.size) * itemsize,
    )

    return pl.pallas_call(
        _scale_mask_kernel,
        out_shape=jax.ShapeDtypeStruct((B, L, C), xf.dtype),
        grid=grid,
        in_specs=[x_spec, m_spec],
        out_specs=o_spec,
        compiler_params=pltpu.CompilerParams(
            dimension_semantics=("parallel", "parallel")),
        cost_estimate=cost,
    )(xf, m_arr)


# ----------------------------------------------------------------------------- public API

def dropout_nd(x, key, *, p: float = 0.5, tie: bool = True,
               transposed: bool = True, training: bool = True):
    """JAX/Pallas equivalent of DropoutNd.forward.

    x: (batch, dim, lengths...) if transposed else (batch, lengths..., dim)
    key: jax PRNG key used to draw the dropout mask.
    """
    if p < 0 or p >= 1:
        raise ValueError(
            "dropout probability has to be in [0, 1), but got {}".format(p))
    if not training or p == 0.0:
        return x

    scale = 1.0 / (1.0 - p)

    if transposed:
        B, C = x.shape[0], x.shape[1]
        lengths = x.shape[2:]
        L = int(np.prod(lengths)) if lengths else 1
        mask_shape = (B, C) if tie else (B, C, L)
        keep = jax.random.uniform(key, mask_shape) < (1.0 - p)
        m = keep.astype(x.dtype) * jnp.asarray(scale, dtype=x.dtype)
        out = _dropout_channels_first(x.reshape(B, C, L), m, tie)
        return out.reshape(x.shape)
    else:
        # Channel-last handled natively in the kernel: no moveaxis/transpose through HBM.
        B, C = x.shape[0], x.shape[-1]
        lengths = x.shape[1:-1]
        L = int(np.prod(lengths)) if lengths else 1
        mask_shape = (B, C) if tie else (B, L, C)
        keep = jax.random.uniform(key, mask_shape) < (1.0 - p)
        m = keep.astype(x.dtype) * jnp.asarray(scale, dtype=x.dtype)
        out = _dropout_channels_last(x.reshape(B, L, C), m, tie)
        return out.reshape(x.shape)


# ----------------------------------------------------------------------------- demo / sanity check

if __name__ == "__main__":
    root = jax.random.PRNGKey(0)
    kx, kd, kx2 = jax.random.split(root, 3)

    # Channels-first (transposed=True, module default): X = (batch, dim, lengths...) = (2, 4, 16, 16)
    B, C, H, W = 2, 4, 16, 16
    p = 0.5
    x = jax.random.normal(kx, (B, C, H, W), dtype=jnp.float32)

    y = dropout_nd(x, kd, p=p, tie=True, transposed=True, training=True)
    y = jax.block_until_ready(y)

    scaled = x * (1.0 / (1.0 - p))
    ok_vals = jnp.all(jnp.isclose(y, 0.0) | jnp.isclose(y, scaled, atol=1e-5))
    per_chan_zero = jnp.all(jnp.isclose(y, 0.0), axis=(2, 3))
    per_chan_keep = jnp.all(jnp.isclose(y, scaled, atol=1e-5), axis=(2, 3))
    tied_ok = jnp.all(per_chan_zero | per_chan_keep)
    assert bool(ok_vals), "output values not in {0, x/(1-p)}"
    assert bool(tied_ok), "dropout mask not tied across length dims"

    # Channels-last (transposed=False): X = (batch, lengths..., dim) = (2, 8, 4)
    B2, S, C2 = 2, 8, 4
    x2 = jax.random.normal(kx2, (B2, S, C2), dtype=jnp.float32)
    y2 = dropout_nd(x2, kd, p=p, tie=True, transposed=False, training=True)
    y2 = jax.block_until_ready(y2)
    scaled2 = x2 * (1.0 / (1.0 - p))
    ok2 = jnp.all(jnp.isclose(y2, 0.0) | jnp.isclose(y2, scaled2, atol=1e-5))
    tied2 = jnp.all(jnp.all(jnp.isclose(y2, 0.0), axis=1)
                    | jnp.all(jnp.isclose(y2, scaled2, atol=1e-5), axis=1))
    assert bool(ok2), "channels-last output values not in {0, x/(1-p)}"
    assert bool(tied2), "channels-last dropout mask not tied across length dims"

    # Eval mode is identity.
    y_eval = dropout_nd(x, kd, p=p, tie=True, transposed=True, training=False)
    assert bool(jnp.all(y_eval == x)), "eval mode must be identity"

    print("KERNEL_OK")
</pallas_src>

<mosaic_0001>
module attributes {stable_mosaic.version = 11 : i64} {
  func.func @_scale_mask_kernel(%arg0: i32, %arg1: i32, %arg2: memref<1x4x2x128xf32, #tpu.memory_space<vmem>>, %arg3: memref<1x4x1x1xf32, #tpu.memory_space<vmem>>, %arg4: memref<1x4x2x128xf32, #tpu.memory_space<vmem>>) attributes {dimension_semantics = [#tpu.dimension_semantics<parallel>, #tpu.dimension_semantics<parallel>], iteration_bounds = array<i64: 2, 1>, scalar_prefetch = 0 : i64, scratch_operands = 0 : i64, tpu.core_type = #tpu.core_type<tc>, window_params = [{transform_indices = @transform_0, window_bounds = array<i64: 1, 4, 2, 128>}, {transform_indices = @transform_1, window_bounds = array<i64: 1, 4, 1, 1>}, {transform_indices = @transform_2, window_bounds = array<i64: 1, 4, 2, 128>}]} {
    %c0 = arith.constant 0 : index
    %c0_0 = arith.constant 0 : index
    %c0_1 = arith.constant 0 : index
    %c0_2 = arith.constant 0 : index
    %0 = vector.load %arg2[%c0, %c0_0, %c0_1, %c0_2] : memref<1x4x2x128xf32, #tpu.memory_space<vmem>>, vector<1x4x2x128xf32>
    %c0_3 = arith.constant 0 : index
    %c0_4 = arith.constant 0 : index
    %c0_5 = arith.constant 0 : index
    %c0_6 = arith.constant 0 : index
    %1 = vector.load %arg3[%c0_3, %c0_4, %c0_5, %c0_6] : memref<1x4x1x1xf32, #tpu.memory_space<vmem>>, vector<1x4x1x1xf32>
    %2 = vector.broadcast %1 : vector<1x4x1x1xf32> to vector<1x4x2x128xf32>
    %3 = arith.mulf %0, %2 : vector<1x4x2x128xf32>
    %c0_7 = arith.constant 0 : index
    %c0_8 = arith.constant 0 : index
    %c0_9 = arith.constant 0 : index
    %c0_10 = arith.constant 0 : index
    %4 = vector.load %arg4[%c0_7, %c0_8, %c0_9, %c0_10] : memref<1x4x2x128xf32, #tpu.memory_space<vmem>>, vector<1x4x2x128xf32>
    tpu.vector_store %arg4[%c0_7, %c0_8, %c0_9, %c0_10], %3 {strides = array<i32>} : memref<1x4x2x128xf32, #tpu.memory_space<vmem>>, vector<1x4x2x128xf32>,
    return
  }
  func.func @transform_0(%arg0: i32, %arg1: i32) -> (i32, i32, i32, i32) {
    %c0_i32 = arith.constant 0 : i32
    %c0_i32_0 = arith.constant 0 : i32
    %c0_i32_1 = arith.constant 0 : i32
    return %arg0, %c0_i32, %arg1, %c0_i32_0 : i32, i32, i32, i32
  }
  func.func @transform_1(%arg0: i32, %arg1: i32) -> (i32, i32, i32, i32) {
    %c0_i32 = arith.constant 0 : i32
    %c0_i32_0 = arith.constant 0 : i32
    %c0_i32_1 = arith.constant 0 : i32
    %c0_i32_2 = arith.constant 0 : i32
    return %arg0, %c0_i32, %c0_i32_0, %c0_i32_1 : i32, i32, i32, i32
  }
  func.func @transform_2(%arg0: i32, %arg1: i32) -> (i32, i32, i32, i32) {
    %c0_i32 = arith.constant 0 : i32
    %c0_i32_0 = arith.constant 0 : i32
    %c0_i32_1 = arith.constant 0 : i32
    return %arg0, %c0_i32, %arg1, %c0_i32_0 : i32, i32, i32, i32
  }
}

</mosaic_0001>

<bundles_post_ra>
// kernel: tpu_custom_call.1
= control target key start
LH: loop header
LB: loop body
LE: loop exit
PB: predicated region body
PF: predicated region fallthrough
CT: control target
= control target key end

     0   :  { %7 = vsyncpa [#allocation3], 0  ;;  %s767_s0 = inlined_call_operand.hbm [shape: f32[2,4,2,128], index: 0, kind: input, shape index: {}]   ;;  %s768_s1 = inlined_call_operand.vmem [shape: f32[2,4,1,1], index: 1, kind: input, shape index: {}]   ;;  %s769_s2 = inlined_call_operand.hbm [shape: f32[2,4,2,128], index: 2, kind: output, shape index: {}]  }
   0x1   :  { %9 = vsyncpa [#allocation3 + $0x1], 0 }
   0x2   :  { %10 = vsyncpa [#allocation4], 0 }
   0x3   :  { %12 = vsyncpa [#allocation4 + $0x1], 0  ;;  %s587_s9 = smov 0   ;;  %s589_s10 = smov 0  }
   0x4   :  { %s591_s11 = smov 0   ;;  %s593_s12 = smov 0  }
   0x5   :  { %s595_s13 = smov 0   ;;  %s597_s14 = smov 0  }
   0x6 LB: > { %s360_s15 = sadd.s32 4294967295, %s563_s14   ;;  %s361_s16 = sadd.s32 4294967294, %s563_s14   ;;  %s563_s14 = sphi %s597_s14, %s18_s14   ;;  %s559_s13 = sphi %s595_s13, %s784_s13   ;;  %s555_s12 = sphi %s593_s12, %s783_s12   ;;  %s551_s11 = sphi %s591_s11, %s782_s11   ;;  %s547_s10 = sphi %s589_s10, %s781_s10   ;;  %s543_s9 = sphi %s587_s9, %s780_s9  }
   0x7   : > { %s30_s17 = sadd.s32 1, %s559_s13  ;;  %s39_s18 = sadd.s32 1, %s551_s11 }
   0x8   : > { %p32_p0 = scmp.ge.s32.totalorder %s30_s17, 2  ;;  %p46_p1 = scmp.ne.s32.totalorder %s551_s11, %s547_s10 }
   0x9   : > { %p47_p2 = scmp.eq.s32.totalorder %s563_s14, 0  ;;  %p52_p3 = scmp.ne.s32.totalorder %s547_s10, %s543_s9 }
   0xa   : > { %s786_s17 = smov (%p32_p0, %s30_s17), 0  ;;  %p53_p5 = scmp.eq.s32.totalorder %s360_s15, 0 }
   0xb   : > { %p628_p4 = por %p47_p2, %p46_p1  ;;  %s34_s20 = ssub.s32 %s559_s13, %s786_s17 }
   0xc   : > { %p104_p6 = scmp.eq.s32.totalorder %s360_s15, 1  ;;  %p37_p7 = scmp.eq.s32.totalorder %s34_s20, 0 }
   0xd   : > { %p634_p8 = por %p53_p5, %p52_p3  ;;  %p110_p10 = scmp.eq.s32.totalorder %s361_s16, 1 }
   0xe   : > { %p638_p9 = por %p104_p6, %p46_p1  ;;  %p394_p13 = scmp.lt.s32.totalorder %s563_s14, 2 }
   0xf   : > { %s643_s23 = scalar_select %p37_p7, %s551_s11, %s39_s18  }
  0x10   : > { %s773_s22 = scalar_select %p638_p9, 1, 0 }
  0x11   : > { %p645_p11 = por %p110_p10, %p52_p3  ;;  %s130_s25 = sand.u32 1, %s551_s11  }
  0x12   : > { %s364_s26 = sshll.u32 %s130_s25, 3  ;;  %s380_s27 = sshll.u32 %s559_s13, 7 }
  0x13   : > { %s774_s24 = scalar_select %p645_p11, 1, 0 }
  0x14   : > { %s656_s30 = scalar_lea.hbm %s767_s0, %s380_s27  ;;  %s134_s3 = scalar_lea.vmem [#allocation2], %s364_s26 }
  0x15   : > { %s142_s4 = sshll.u32 %s134_s3, 4  ;;  %p662_p0 = pnand %p394_p13, %p628_p4  ;;  %s658_s4 = int_to_ptr.vmem [resolvable:$true] %s142_s4 }
  0x16   : > { %s667_s6 = scalar_lea.sflag [#allocation3], %s130_s25  ;;  %s451_s7 = scalar_lea.hbm %s656_s30, 128 }
  0x17   : > { %p452_p2 = scmp.ne.s32.totalorder %s656_s30, %s451_s7  ;;  %p453_p3 = pneg %p662_p0 }
  0x18   : > { %s456_s16 = scalar_lea.hbm %s767_s0, 256  ;;  %p457_p4 = scmp.lt.u32.totalorder %s656_s30, %s767_s0 }
  0x19   : > { %p454_p5 = pnand %p453_p3, %p452_p2  ;;  %p458_p7 = scmp.lt.u32.totalorder %s456_s16, %s451_s7 }
  0x1a   : > { %p460_p13 = scmp.lt.u32.totalorder %s451_s7, %s656_s30 }
  0x1b   : > { %p455_p6 = pneg %p454_p5  ;;  %p459_p10 = por %p458_p7, %p457_p4 }
  0x1d   : > { %p461_p12 = por %p460_p13, %p459_p10 }
  0x1f   : > { %p462_p1 = pnand %p461_p12, %p455_p6 }
  0x21   : > { %465 = shalt.err (!%p462_p1)
}
  0x22   : > { %s466_s20 = scalar_lea.vmem %s658_s4, 128  ;;  %s565_s25 = smov [#allocation2]  }
  0x23   : > { %p467_p2 = scmp.ne.s32.totalorder %s658_s4, %s466_s20  ;;  %s471_s26 = sshll.u32 %s565_s25, 4  ;;  %s472_s26 = int_to_ptr.vmem [resolvable:$false] %s471_s26 }
  0x24   : > { %s473_s27 = scalar_lea.vmem %s472_s26, 256  ;;  %p474_p9 = scmp.lt.s32.totalorder %s658_s4, %s472_s26 }
  0x25   : > { %p469_p5 = pnand %p467_p2, %p453_p3  ;;  %p475_p4 = scmp.lt.s32.totalorder %s473_s27, %s466_s20 }
  0x27   : > { %p470_p11 = pneg %p469_p5  ;;  %p476_p7 = por %p475_p4, %p474_p9 }
  0x29   : > { %p477_p10 = pnand %p476_p7, %p470_p11 }
  0x2b   : > { %480 = shalt.err (!%p477_p10)
}
  0x2c   : > { %s566_s28 = smov 32   ;;  %s567_s29 = smov 2  }
  0x2d   : > { %389 = dma.hbm_to_vmem [thread:$0]  (!%p662_p0), %s656_s30, 128, %s658_s4, %s667_s6, %s566_s28, %s566_s28, %s567_s29  }
  0x2e   : > { %p157_p12 = scmp.lt.s32.totalorder %s563_s14, 3  ;;  %p776_p1 = scmp.ge.s32.totalorder %s563_s14, 1 }
  0x30   : > { %p158_p3 = pnand %p776_p1, %p157_p12 }
  0x31   : > { %s699_s3 = sand.u32 (!%p158_p3), 1, %s547_s10  }
  0x32   : > { %161 = sbr.rel (%p158_p3) target bundleno = 214 (0xd6), region = 28  ;;  %s368_s7 = sshll.u32 (!%p158_p3), %s699_s3, 3 }
  0x33   : > { %s164_s8 = scalar_lea.sflag (!%p158_p3), [#allocation3], %s699_s3  ;;  %s167_s15 = scalar_lea.vmem (!%p158_p3), [#allocation2], %s368_s7 }
  0x39   : > { %534 = dma.done.wait (%p634_p8), %s164_s8, 128  }
  0x3a   : > { %536 = vsyncadd (%p634_p8), %s164_s8, 4294967168  ;;  %p192_p9 = scmp.lt.s32.totalorder %s555_s12, 1  ;;  %v568_v0 = vmov 0   ;;  %v198_v5 = vld [vmem:[%s167_s15 + $0x4] sm:$0x3]  ;;  %s191_s21 = scalar_lea.vmem [#allocation5], %s368_s7 }
  0x3b   : > { %450 = vset.pattern.permute.xlu1 %v568_v0  ;;  %449 = vset.pattern.permute.xlu0 %v568_v0  ;;  %v196_v6 = vld [vmem:[%s167_s15] sm:$0x3]  ;;  %s263_s18 = sshll.u32 %s191_s21, 4  ;;  %s381_s19 = sshll.u32 %s555_s12, 7  ;;  %v199_v11 = vld [vmem:[%s167_s15 + $0x6] sm:$0x3]  ;;  %s713_s18 = int_to_ptr.vmem [resolvable:$true] %s263_s18 }
  0x3c   : > { %s193_s30 = scalar_select %p192_p9, %s555_s12, 1  ;;  %v197_v12 = vld [vmem:[%s167_s15 + $0x2] sm:$0x3] }
  0x3d   : > { %s718_s26 = scalar_lea.hbm %s769_s2, %s381_s19  ;;  %s249_s12 = scalar_lea.sflag [#allocation4], %s699_s3 }
  0x3e   : > { %s370_s4 = sshll.u32 %s193_s30, 2  ;;  %s481_s27 = scalar_lea.vmem %s713_s18, 128 }
  0x3f   : > { %s195_s16 = scalar_lea.vmem %s768_s1, %s370_s4  ;;  %p482_p8 = scmp.ne.s32.totalorder %s713_s18, %s481_s27 }
  0x40   : > { %v373_v1 = vld [vmem:[%s195_s16 + $0x2] ss:$0 sm:$0xff]  ;;  %v371_v2 = vld [vmem:[%s195_s16] ss:$0 sm:$0xff]  ;;  %v374_v3 = vld [vmem:[%s195_s16 + $0x3] ss:$0 sm:$0xff] }
  0x41   : > { %233 = vperm.xlu1 %450, %v373_v1   ;;  %225 = vperm.xlu0 %449, %v371_v2   ;;  %v372_v4 = vld [vmem:[%s195_s16 + $0x1] ss:$0 sm:$0xff]  ;;  %p777_p11 = scmp.ne.s32.totalorder %s773_s22, 0  ;;  %s569_s28 = smov [#allocation5]  }
  0x42   : > { %s485_s29 = sshll.u32 %s569_s28, 4  ;;  %s486_s29 = int_to_ptr.vmem [resolvable:$false] %s485_s29 }
  0x43   : > { %p483_p0 = pnand %p482_p8, %p777_p11  ;;  %s487_s7 = scalar_lea.vmem %s486_s29, 256 }
  0x44   : > { %p488_p13 = scmp.lt.s32.totalorder %s713_s18, %s486_s29  ;;  %p489_p2 = scmp.lt.s32.totalorder %s487_s7, %s481_s27 }
  0x45   : > { %237 = vperm.xlu1 %450, %v374_v3   ;;  %229 = vperm.xlu0 %449, %v372_v4   ;;  %p484_p6 = pneg %p483_p0 }
  0x46   : > { %p490_p5 = por %p489_p2, %p488_p13 }
  0x48   : > { %p491_p4 = pnand %p490_p5, %p484_p6 }
  0xc0   : > { %v234_v7 = vpop.permute.xlu1 %233  ;;  %v226_v8 = vpop.permute.xlu0 %225 }
  0xc1   : > { %v242_v9 = vmul.f32 %v234_v7, %v198_v5  ;;  %v240_v10 = vmul.f32 %v226_v8, %v196_v6 }
  0xc3   : > { %246 = vst [vmem:[%s191_s21 + $0x4] sm:$0x3] %v242_v9  ;;  %244 = vst [vmem:[%s191_s21] sm:$0x3] %v240_v10 }
  0xc4   : > { %v238_v13 = vpop.permute.xlu1 %237  ;;  %v230_v14 = vpop.permute.xlu0 %229 }
  0xc5   : > { %v243_v15 = vmul.f32 %v238_v13, %v199_v11  ;;  %v241_v16 = vmul.f32 %v230_v14, %v197_v12 }
  0xc7   : > { %247 = vst [vmem:[%s191_s21 + $0x6] sm:$0x3] %v243_v15  ;;  %245 = vst [vmem:[%s191_s21 + $0x2] sm:$0x3] %v241_v16 }
  0xc8   : > { %494 = shalt.err (!%p491_p4)
}
  0xc9   : > { %s495_s8 = scalar_lea.hbm %s718_s26, 128  ;;  %s499_s4 = scalar_lea.hbm %s769_s2, 256 }
  0xca   : > { %p496_p7 = scmp.ne.s32.totalorder %s718_s26, %s495_s8  ;;  %p500_p1 = scmp.lt.u32.totalorder %s718_s26, %s769_s2 }
  0xcb   : > { %p501_p3 = scmp.lt.u32.totalorder %s499_s4, %s495_s8  ;;  %p503_p8 = scmp.lt.u32.totalorder %s495_s8, %s718_s26 }
  0xcc   : > { %p497_p10 = pnand %p496_p7, %p777_p11 }
  0xcd   : > { %p502_p9 = por %p501_p3, %p500_p1 }
  0xce   : > { %p498_p12 = pneg %p497_p10 }
  0xcf   : > { %p504_p0 = por %p503_p8, %p502_p9 }
  0xd1   : > { %p505_p6 = pnand %p504_p0, %p498_p12 }
  0xd3   : > { %508 = shalt.err (!%p505_p6)
}
  0xd4   : > { %s570_s16 = smov 32   ;;  %s571_s21 = smov 2  }
  0xd5   : > { %384 = dma.vmem_to_hbm [thread:$0]  (%p777_p11), %s713_s18, 128, %s718_s26, %s249_s12, %s570_s16, %s570_s16, %s571_s21  }
  0xd6 PF: > { %s278_s19 = sand.u32 1, %s543_s9   ;;  %p778_p13 = scmp.ne.s32.totalorder %s774_s24, 0 }
  0xd7   : > { %p779_p2 = scmp.ge.s32.totalorder %s563_s14, 2  ;;  %s279_s20 = scalar_lea.sflag [#allocation4], %s278_s19 }
  0xd9   : > { %p391_p5 = pnand %p779_p2, %p778_p13 }
  0xdb   : > { %538 = dma.done.wait (!%p391_p5), %s279_s20, 128  }
  0xdc   : > { %540 = vsyncadd (!%p391_p5), %s279_s20, 4294967168  ;;  %s18_s14 = sadd.s32 1, %s563_s14   ;;  %s780_s9 = smov %s547_s10 }
  0xdd   : > { %p15_p4 = scmp.ge.s32.totalorder %s18_s14, 4   ;;  %s781_s10 = smov %s551_s11 }
  0xde   : > { %s782_s11 = smov %s643_s23  ;;  %s783_s12 = smov %s559_s13 }
  0xdf   : > { %s784_s13 = smov %s786_s17  ;;  %17 = sbr.rel (!%p15_p4) target bundleno = 6 (0x6), region = 76 }
  0xe6   :  { %284 = vsyncpa [#allocation3], 1 }
  0xe7   :  { %286 = vsyncpa [#allocation3 + $0x1], 1 }
  0xe8   :  { %287 = vsyncpa [#allocation4], 1 }
  0xe9   :  { %289 = vsyncpa [#allocation4 + $0x1], 1 }

</bundles_post_ra>
